<compile_context>
chip_gen: v7x
topology: tpu7x:2x2x1
jax: 0.10.0
libtpu: 0.0.40
codegen_flags: <defaults>
</compile_context>

<pallas_src>
import functools

import jax
import jax.numpy as jnp
from jax import lax
from jax.experimental import pallas as pl
from jax.experimental.pallas import tpu as pltpu


def _round_up(x, m):
    return (x + m - 1) // m * m


def _gru_kernel(maxlen_ref, lens_ref, x_ref, h0_ref, wih_ref, whh_ref,
                bgi_ref, bhn_ref, out_ref, h_scr, gi_scr, *, Tc, Bb, Hp):
    """One (batch_block, time_chunk) grid step of the GRU recurrence."""
    c = pl.program_id(1)
    n_chunks = pl.num_programs(1)

    @pl.when(c == 0)
    def _init():
        h_scr[...] = h0_ref[...]

    chunk_start = c * Tc
    # Number of timesteps in this chunk that are < max(src_len); everything
    # past that is a guaranteed no-op (pack_padded_sequence semantics).
    steps = jnp.minimum(jnp.maximum(maxlen_ref[0] - chunk_start, 0), Tc)

    @pl.when(steps > 0)
    def _chunk():
        # Hoisted, non-recurrent input projection for the whole chunk:
        # one (Tc*Bb, E) @ (E, 3*Hp) bf16 MXU call, f32 accumulation, folded
        # biases (b_ih for all gates + b_hh for r/z) added once.
        gi_scr[...] = (
            jnp.dot(x_ref[0], wih_ref[...],
                    preferred_element_type=jnp.float32)
            + bgi_ref[...])

        lens = lens_ref[...]          # (Bb, 1) int32
        whh = whh_ref[...]            # (Hp, 3*Hp) bf16
        b_hn = bhn_ref[...]           # (1, Hp) f32  (b_hh of the n gate)

        # TODO(synk): hold W_hh in MXU weight registers across timesteps with
        # pltpu.matmul_push_rhs / matmul_acc_lhs / matmul_pop to avoid
        # re-streaming the loop-invariant RHS every step (kept as jnp.dot for
        # portability/robustness here).
        def step(t, h):
            row = pl.multiple_of(t * Bb, 8)
            gi = gi_scr[pl.ds(row, Bb), :]                     # (Bb, 3*Hp) f32
            gh = jnp.dot(h.astype(jnp.bfloat16), whh,
                         preferred_element_type=jnp.float32)   # (Bb, 3*Hp) f32

            # Gate-aligned layout: r|z occupy the first 2*Hp lanes -> one
            # fused wide sigmoid; n gate applies b_hh_n inside the r-product
            # exactly like torch.nn.GRU.
            rz = jax.nn.sigmoid(gi[:, :2 * Hp] + gh[:, :2 * Hp])
            r, zg = rz[:, :Hp], rz[:, Hp:]
            n = jnp.tanh(gi[:, 2 * Hp:] + r * (gh[:, 2 * Hp:] + b_hn))
            h_new = n + zg * (h - n)

            # pack_padded_sequence: hidden only advances while t < src_len[b].
            valid = (chunk_start + t) < lens                   # (Bb, 1) bool
            return jnp.where(valid, h_new, h)

        h_scr[...] = lax.fori_loop(0, steps, step, h_scr[...])

    @pl.when(c == n_chunks - 1)
    def _finalize():
        out_ref[...] = h_scr[...]


def gru_final_hidden(x_emb, src_len, h0, w_ih, w_hh, b_ih, b_hh, *, tc=4):
    """x_emb: (T, B, E) f32, src_len: (B,) i32, h0: (B, H) f32.
    GRU params in PyTorch layout: w_ih (3H, E), w_hh (3H, H), biases (3H,).
    Returns the final (length-masked) hidden state (B, H) f32."""
    T, B, E = x_emb.shape
    H = h0.shape[-1]
    Bp = _round_up(max(B, 8), 8)         # f32 sublane multiple
    Hp = _round_up(max(H, 128), 128)     # lane multiple -> gate-aligned slabs

    # Batch-parallel grid axis for megacore (v7x) when the batch is big enough.
    n_bb = 2 if (Bp >= 16 and Bp % 16 == 0) else 1
    Bb = Bp // n_bb

    # Time chunking. At scale pick Tc so that the (Tc*Bb, 3*Hp) f32 gate
    # scratch plus the double-buffered bf16 x chunk stays a few MiB.
    Tc = max(1, min(tc, T))
    T_pad = _round_up(T, Tc)
    n_tc = T_pad // Tc

    # ---- parameter packing (gate-aligned 128-lane slabs, bf16 MXU operands) --
    def pack_gates(w):                   # (3H, K) -> (K, 3*Hp) bf16
        r, z, n = jnp.split(w, 3, axis=0)
        cols = [jnp.pad(g.T, ((0, 0), (0, Hp - H))) for g in (r, z, n)]
        return jnp.concatenate(cols, axis=1).astype(jnp.bfloat16)

    def pad_h(v):                        # (H,) -> (Hp,)
        return jnp.pad(v, (0, Hp - H))

    wih_p = pack_gates(w_ih)                                    # (E, 3*Hp) bf16
    whh_p = jnp.pad(pack_gates(w_hh), ((0, Hp - H), (0, 0)))    # (Hp, 3*Hp) bf16

    bih_r, bih_z, bih_n = jnp.split(b_ih, 3)
    bhh_r, bhh_z, bhh_n = jnp.split(b_hh, 3)
    # Folded bias for the hoisted projection: b_ih (all) + b_hh (r, z only).
    bgi_p = jnp.concatenate([pad_h(bih_r + bhh_r),
                             pad_h(bih_z + bhh_z),
                             pad_h(bih_n)]).reshape(1, 3 * Hp)  # f32
    bhn_p = pad_h(bhh_n).reshape(1, Hp)                         # f32

    # ---- data packing ------------------------------------------------------
    # x arranged as (n_bb, T_pad*Bb, E) so the kernel only ever sees 2-D tiles.
    x_pad = jnp.pad(x_emb, ((0, T_pad - T), (0, Bp - B), (0, 0)))
    x_arr = (x_pad.reshape(T_pad, n_bb, Bb, E)
             .transpose(1, 0, 2, 3)
             .reshape(n_bb, T_pad * Bb, E)
             .astype(jnp.bfloat16))
    h0_p = jnp.pad(h0, ((0, Bp - B), (0, Hp - H)))              # (Bp, Hp) f32
    len_p = jnp.pad(src_len.astype(jnp.int32), (0, Bp - B)).reshape(Bp, 1)
    max_len = jnp.max(src_len).astype(jnp.int32).reshape(1)     # scalar prefetch

    out = pl.pallas_call(
        functools.partial(_gru_kernel, Tc=Tc, Bb=Bb, Hp=Hp),
        out_shape=jax.ShapeDtypeStruct((Bp, Hp), jnp.float32),
        grid_spec=pltpu.PrefetchScalarGridSpec(
            num_scalar_prefetch=1,                 # max(src_len) -> SMEM
            grid=(n_bb, n_tc),
            in_specs=[
                pl.BlockSpec((Bb, 1), lambda b, c, ml: (b, 0)),        # lengths
                pl.BlockSpec((1, Tc * Bb, E), lambda b, c, ml: (b, c, 0)),  # x chunk
                pl.BlockSpec((Bb, Hp), lambda b, c, ml: (b, 0)),       # init hidden
                pl.BlockSpec((E, 3 * Hp), lambda b, c, ml: (0, 0)),    # W_ih^T
                pl.BlockSpec((Hp, 3 * Hp), lambda b, c, ml: (0, 0)),   # W_hh^T
                pl.BlockSpec((1, 3 * Hp), lambda b, c, ml: (0, 0)),    # folded bias
                pl.BlockSpec((1, Hp), lambda b, c, ml: (0, 0)),        # b_hh (n gate)
            ],
            out_specs=pl.BlockSpec((Bb, Hp), lambda b, c, ml: (b, 0)),
            scratch_shapes=[
                pltpu.VMEM((Bb, Hp), jnp.float32),          # carried hidden state
                pltpu.VMEM((Tc * Bb, 3 * Hp), jnp.float32), # per-chunk gate preacts
            ],
        ),
        compiler_params=pltpu.CompilerParams(
            dimension_semantics=("parallel", "arbitrary"),
            vmem_limit_bytes=32 * 1024 * 1024),
    )(max_len, len_p, x_arr, h0_p, wih_p, whh_p, bgi_p, bhn_p)
    return out[:B, :H]


def encoder_forward(params, labels, src, src_len, dim_y, dim_z):
    """labels: (B,) int32, src: (T, B) int32, src_len: (B,) int32 -> z: (B, dim_z)."""
    B = labels.shape[0]
    # Embedding lookup: data-dependent gather, kept in plain JAX (glue).
    x_emb = params["embed"][src]                            # (T, B, E) f32
    # fc(labels): Linear(1, dim_y) applied to float labels (tiny glue).
    labels_f = labels.astype(jnp.float32).reshape(B, 1)
    init_y = labels_f @ params["fc_w"].T + params["fc_b"]   # (B, dim_y)
    init_z = jnp.zeros((B, dim_z), jnp.float32)             # buffer init_z repeated
    h0 = jnp.concatenate([init_y, init_z], axis=-1)         # (B, dim_y + dim_z)

    hidden = gru_final_hidden(x_emb, src_len, h0,
                              params["w_ih"], params["w_hh"],
                              params["b_ih"], params["b_hh"])
    return hidden[:, dim_y:]                                # z


def _reference_forward(params, labels, src, src_len, dim_y, dim_z):
    """Pure-JAX f32 reference (lax.scan GRU with length masking)."""
    B = labels.shape[0]
    H = dim_y + dim_z
    x_emb = params["embed"][src]
    labels_f = labels.astype(jnp.float32).reshape(B, 1)
    h0 = jnp.concatenate(
        [labels_f @ params["fc_w"].T + params["fc_b"],
         jnp.zeros((B, dim_z), jnp.float32)], axis=-1)

    w_ih_t, w_hh_t = params["w_ih"].T, params["w_hh"].T
    b_ih, b_hh = params["b_ih"], params["b_hh"]

    def step(h, inp):
        x_t, t = inp
        gi = x_t @ w_ih_t + b_ih
        gh = h @ w_hh_t + b_hh
        i_r, i_z, i_n = gi[:, :H], gi[:, H:2 * H], gi[:, 2 * H:]
        h_r, h_z, h_n = gh[:, :H], gh[:, H:2 * H], gh[:, 2 * H:]
        r = jax.nn.sigmoid(i_r + h_r)
        zg = jax.nn.sigmoid(i_z + h_z)
        n = jnp.tanh(i_n + r * h_n)
        h_new = (1.0 - zg) * n + zg * h
        mask = (t < src_len).reshape(B, 1)
        h = jnp.where(mask, h_new, h)
        return h, None

    T = src.shape[0]
    h_final, _ = lax.scan(step, h0, (x_emb, jnp.arange(T, dtype=jnp.int32)))
    return h_final[:, dim_y:]


if __name__ == "__main__":
    # Small deterministic config (T chosen so the kernel exercises a full
    # chunk, a partial chunk, and a fully-skipped chunk with Tc=4).
    VOCAB, EMB_DIM = 20, 16
    DIM_Y, DIM_Z = 8, 16
    H = DIM_Y + DIM_Z
    T, B = 12, 4

    key = jax.random.PRNGKey(0)
    ks = jax.random.split(key, 10)

    params = {
        "embed": jax.random.normal(ks[0], (VOCAB, EMB_DIM), jnp.float32) * 0.1,
        "fc_w": jax.random.normal(ks[1], (DIM_Y, 1), jnp.float32) * 0.1,
        "fc_b": jax.random.normal(ks[2], (DIM_Y,), jnp.float32) * 0.1,
        "w_ih": jax.random.normal(ks[3], (3 * H, EMB_DIM), jnp.float32) * 0.1,
        "w_hh": jax.random.normal(ks[4], (3 * H, H), jnp.float32) * 0.1,
        "b_ih": jax.random.normal(ks[5], (3 * H,), jnp.float32) * 0.1,
        "b_hh": jax.random.normal(ks[6], (3 * H,), jnp.float32) * 0.1,
    }

    labels = jax.random.randint(ks[7], (B,), 0, 2, jnp.int32)
    src = jax.random.randint(ks[8], (T, B), 0, VOCAB, jnp.int32)
    src_len = jnp.array([7, 5, 3, 6], jnp.int32)   # max < T: exercises early exit

    fwd = jax.jit(functools.partial(encoder_forward, dim_y=DIM_Y, dim_z=DIM_Z))
    z = fwd(params, labels, src, src_len)
    jax.block_until_ready(z)

    z_ref = _reference_forward(params, labels, src, src_len, DIM_Y, DIM_Z)
    assert z.shape == (B, DIM_Z)
    # bf16 MXU operands (f32 accumulation) -> not bit-exact vs the f32 reference.
    assert jnp.allclose(z, z_ref, atol=2e-2, rtol=2e-2), (
        float(jnp.max(jnp.abs(z - z_ref))))

    print("KERNEL_OK")
</pallas_src>

<mosaic_0001>
module attributes {stable_mosaic.version = 11 : i64} {
  func.func @_gru_kernel(%arg0: i32, %arg1: i32, %arg2: memref<1xi32, #tpu.memory_space<smem>>, %arg3: memref<8x1xi32, #tpu.memory_space<vmem>>, %arg4: memref<1x32x16xbf16, #tpu.memory_space<vmem>>, %arg5: memref<8x128xf32, #tpu.memory_space<vmem>>, %arg6: memref<16x384xbf16, #tpu.memory_space<vmem>>, %arg7: memref<128x384xbf16, #tpu.memory_space<vmem>>, %arg8: memref<1x384xf32, #tpu.memory_space<vmem>>, %arg9: memref<1x128xf32, #tpu.memory_space<vmem>>, %arg10: memref<8x128xf32, #tpu.memory_space<vmem>>, %arg11: memref<8x128xf32, #tpu.memory_space<vmem>>, %arg12: memref<32x384xf32, #tpu.memory_space<vmem>>) attributes {dimension_semantics = [#tpu.dimension_semantics<parallel>, #tpu.dimension_semantics<arbitrary>], iteration_bounds = array<i64: 1, 3>, scalar_prefetch = 1 : i64, scratch_operands = 2 : i64, tpu.core_type = #tpu.core_type<tc>, window_params = [{transform_indices = @transform_0, window_bounds = array<i64: 8, 1>}, {transform_indices = @transform_1, window_bounds = array<i64: 1, 32, 16>}, {transform_indices = @transform_2, window_bounds = array<i64: 8, 128>}, {pipeline_mode = #tpu.pipeline_mode<synchronous>, transform_indices = @transform_3, window_bounds = array<i64: 16, 384>}, {pipeline_mode = #tpu.pipeline_mode<synchronous>, transform_indices = @transform_4, window_bounds = array<i64: 128, 384>}, {pipeline_mode = #tpu.pipeline_mode<synchronous>, transform_indices = @transform_5, window_bounds = array<i64: 1, 384>}, {pipeline_mode = #tpu.pipeline_mode<synchronous>, transform_indices = @transform_6, window_bounds = array<i64: 1, 128>}, {transform_indices = @transform_7, window_bounds = array<i64: 8, 128>}]} {
    %c0_i32 = arith.constant 0 : i32
    %0 = arith.cmpi eq, %arg1, %c0_i32 : i32
    %1 = arith.extui %0 : i1 to i32
    %c0_i32_0 = arith.constant 0 : i32
    %2 = arith.cmpi ne, %1, %c0_i32_0 : i32
    scf.if %2 {
      %c0_6 = arith.constant 0 : index
      %c0_7 = arith.constant 0 : index
      %14 = vector.load %arg5[%c0_6, %c0_7] : memref<8x128xf32, #tpu.memory_space<vmem>>, vector<8x128xf32>
      %c0_8 = arith.constant 0 : index
      %c0_9 = arith.constant 0 : index
      %15 = vector.load %arg11[%c0_8, %c0_9] : memref<8x128xf32, #tpu.memory_space<vmem>>, vector<8x128xf32>
      tpu.vector_store %arg11[%c0_8, %c0_9], %14 {strides = array<i32>} : memref<8x128xf32, #tpu.memory_space<vmem>>, vector<8x128xf32>,
    } else {
    }
    %c4_i32 = arith.constant 4 : i32
    %3 = arith.muli %arg1, %c4_i32 : i32
    %c0 = arith.constant 0 : index
    %4 = memref.load %arg2[%c0] : memref<1xi32, #tpu.memory_space<smem>>
    %5 = arith.subi %4, %3 : i32
    %c0_i32_1 = arith.constant 0 : i32
    %6 = arith.maxsi %5, %c0_i32_1 : i32
    %c4_i32_2 = arith.constant 4 : i32
    %7 = arith.minsi %6, %c4_i32_2 : i32
    %c0_i32_3 = arith.constant 0 : i32
    %8 = arith.cmpi sgt, %7, %c0_i32_3 : i32
    %9 = arith.extui %8 : i1 to i32
    %c0_i32_4 = arith.constant 0 : i32
    %10 = arith.cmpi ne, %9, %c0_i32_4 : i32
    scf.if %10 {
      %c0_6 = arith.constant 0 : index
      %c0_7 = arith.constant 0 : index
      %c0_8 = arith.constant 0 : index
      %14 = vector.load %arg4[%c0_6, %c0_7, %c0_8] : memref<1x32x16xbf16, #tpu.memory_space<vmem>>, vector<1x32x16xbf16>
      %15 = vector.shape_cast %14 : vector<1x32x16xbf16> to vector<32x16xbf16>
      %c0_9 = arith.constant 0 : index
      %c0_10 = arith.constant 0 : index
      %16 = vector.load %arg6[%c0_9, %c0_10] : memref<16x384xbf16, #tpu.memory_space<vmem>>, vector<16x384xbf16>
      %cst = arith.constant dense<0.000000e+00> : vector<32x384xf32>
      %17 = tpu.matmul %15, %16, %cst {dimension_numbers = #tpu.dot_dimension_numbers<[1], [0], [0], [1], [0, 0, 1, 1], [], []>} : vector<32x16xbf16>, vector<16x384xbf16>, vector<32x384xf32> -> vector<32x384xf32>
      %c0_11 = arith.constant 0 : index
      %c0_12 = arith.constant 0 : index
      %18 = vector.load %arg8[%c0_11, %c0_12] : memref<1x384xf32, #tpu.memory_space<vmem>>, vector<1x384xf32>
      %19 = vector.broadcast %18 : vector<1x384xf32> to vector<32x384xf32>
      %20 = arith.addf %17, %19 : vector<32x384xf32>
      %c0_13 = arith.constant 0 : index
      %c0_14 = arith.constant 0 : index
      %21 = vector.load %arg12[%c0_13, %c0_14] : memref<32x384xf32, #tpu.memory_space<vmem>>, vector<32x384xf32>
      tpu.vector_store %arg12[%c0_13, %c0_14], %20 {strides = array<i32>} : memref<32x384xf32, #tpu.memory_space<vmem>>, vector<32x384xf32>,
      %c0_15 = arith.constant 0 : index
      %c0_16 = arith.constant 0 : index
      %22 = vector.load %arg3[%c0_15, %c0_16] : memref<8x1xi32, #tpu.memory_space<vmem>>, vector<8x1xi32>
      %c0_17 = arith.constant 0 : index
      %c0_18 = arith.constant 0 : index
      %23 = vector.load %arg7[%c0_17, %c0_18] : memref<128x384xbf16, #tpu.memory_space<vmem>>, vector<128x384xbf16>
      %c0_19 = arith.constant 0 : index
      %c0_20 = arith.constant 0 : index
      %24 = vector.load %arg9[%c0_19, %c0_20] : memref<1x128xf32, #tpu.memory_space<vmem>>, vector<1x128xf32>
      %c0_21 = arith.constant 0 : index
      %c0_22 = arith.constant 0 : index
      %25 = vector.load %arg11[%c0_21, %c0_22] : memref<8x128xf32, #tpu.memory_space<vmem>>, vector<8x128xf32>
      %c0_i32_23 = arith.constant 0 : i32
      %26 = arith.subi %7, %c0_i32_23 : i32
      %27 = arith.addi %c0_i32_23, %26 : i32
      %c1_i32 = arith.constant 1 : i32
      %28 = scf.for %arg13 = %c0_i32_23 to %27 step %c1_i32 iter_args(%arg14 = %25) -> (vector<8x128xf32>)  : i32 {
        %c8_i32 = arith.constant 8 : i32
        %30 = arith.muli %arg13, %c8_i32 : i32
        %31 = tpu.assume_multiple %30, 8 : i32
        %32 = arith.index_cast %31 : i32 to index
        %c0_26 = arith.constant 0 : index
        %33 = vector.load %arg12[%32, %c0_26] : memref<32x384xf32, #tpu.memory_space<vmem>>, vector<8x384xf32>
        %34 = arith.truncf %arg14 : vector<8x128xf32> to vector<8x128xbf16>
        %cst_27 = arith.constant dense<0.000000e+00> : vector<8x384xf32>
        %35 = tpu.matmul %34, %23, %cst_27 {dimension_numbers = #tpu.dot_dimension_numbers<[1], [0], [0], [1], [0, 0, 1, 1], [], []>} : vector<8x128xbf16>, vector<128x384xbf16>, vector<8x384xf32> -> vector<8x384xf32>
        %36 = vector.extract_strided_slice %33 {offsets = [0, 0], sizes = [8, 256], strides = [1, 1]} : vector<8x384xf32> to vector<8x256xf32>
        %37 = vector.extract_strided_slice %35 {offsets = [0, 0], sizes = [8, 256], strides = [1, 1]} : vector<8x384xf32> to vector<8x256xf32>
        %38 = arith.addf %36, %37 : vector<8x256xf32>
        %39 = arith.negf %38 : vector<8x256xf32>
        %40 = math.exp %39 : vector<8x256xf32>
        %cst_28 = arith.constant 1.000000e+00 : f32
        %41 = vector.broadcast %cst_28 : f32 to vector<8x256xf32>
        %42 = arith.addf %41, %40 : vector<8x256xf32>
        %43 = arith.divf %41, %42 : vector<8x256xf32>
        %44 = vector.extract_strided_slice %43 {offsets = [0, 0], sizes = [8, 128], strides = [1, 1]} : vector<8x256xf32> to vector<8x128xf32>
        %45 = vector.extract_strided_slice %43 {offsets = [0, 128], sizes = [8, 128], strides = [1, 1]} : vector<8x256xf32> to vector<8x128xf32>
        %46 = vector.extract_strided_slice %33 {offsets = [0, 256], sizes = [8, 128], strides = [1, 1]} : vector<8x384xf32> to vector<8x128xf32>
        %47 = vector.extract_strided_slice %35 {offsets = [0, 256], sizes = [8, 128], strides = [1, 1]} : vector<8x384xf32> to vector<8x128xf32>
        %48 = vector.broadcast %24 : vector<1x128xf32> to vector<8x128xf32>
        %49 = arith.addf %47, %48 : vector<8x128xf32>
        %50 = arith.mulf %44, %49 : vector<8x128xf32>
        %51 = arith.addf %46, %50 : vector<8x128xf32>
        %52 = math.tanh %51 : vector<8x128xf32>
        %53 = arith.subf %arg14, %52 : vector<8x128xf32>
        %54 = arith.mulf %45, %53 : vector<8x128xf32>
        %55 = arith.addf %52, %54 : vector<8x128xf32>
        %56 = arith.addi %3, %arg13 : i32
        %57 = vector.broadcast %56 : i32 to vector<8x1xi32>
        %58 = arith.cmpi slt, %57, %22 : vector<8x1xi32>
        %59 = vector.shape_cast %58 : vector<8x1xi1> to vector<8x1xi1>
        %60 = vector.broadcast %59 : vector<8x1xi1> to vector<8x128xi1>
        %61 = arith.select %60, %55, %arg14 : vector<8x128xi1>, vector<8x128xf32>
        scf.yield %61 : vector<8x128xf32>
      }
      %c0_24 = arith.constant 0 : index
      %c0_25 = arith.constant 0 : index
      %29 = vector.load %arg11[%c0_24, %c0_25] : memref<8x128xf32, #tpu.memory_space<vmem>>, vector<8x128xf32>
      tpu.vector_store %arg11[%c0_24, %c0_25], %28 {strides = array<i32>} : memref<8x128xf32, #tpu.memory_space<vmem>>, vector<8x128xf32>,
    } else {
    }
    %c2_i32 = arith.constant 2 : i32
    %11 = arith.cmpi eq, %arg1, %c2_i32 : i32
    %12 = arith.extui %11 : i1 to i32
    %c0_i32_5 = arith.constant 0 : i32
    %13 = arith.cmpi ne, %12, %c0_i32_5 : i32
    scf.if %13 {
      %c0_6 = arith.constant 0 : index
      %c0_7 = arith.constant 0 : index
      %14 = vector.load %arg11[%c0_6, %c0_7] : memref<8x128xf32, #tpu.memory_space<vmem>>, vector<8x128xf32>
      %c0_8 = arith.constant 0 : index
      %c0_9 = arith.constant 0 : index
      %15 = vector.load %arg10[%c0_8, %c0_9] : memref<8x128xf32, #tpu.memory_space<vmem>>, vector<8x128xf32>
      tpu.vector_store %arg10[%c0_8, %c0_9], %14 {strides = array<i32>} : memref<8x128xf32, #tpu.memory_space<vmem>>, vector<8x128xf32>,
    } else {
    }
    return
  }
  func.func @transform_0(%arg0: i32, %arg1: i32, %arg2: memref<1xi32, #tpu.memory_space<smem>>) -> (i32, i32) {
    %c0_i32 = arith.constant 0 : i32
    %c0_i32_0 = arith.constant 0 : i32
    return %arg0, %c0_i32 : i32, i32
  }
  func.func @transform_1(%arg0: i32, %arg1: i32, %arg2: memref<1xi32, #tpu.memory_space<smem>>) -> (i32, i32, i32) {
    %c0_i32 = arith.constant 0 : i32
    %c0_i32_0 = arith.constant 0 : i32
    return %arg0, %arg1, %c0_i32 : i32, i32, i32
  }
  func.func @transform_2(%arg0: i32, %arg1: i32, %arg2: memref<1xi32, #tpu.memory_space<smem>>) -> (i32, i32) {
    %c0_i32 = arith.constant 0 : i32
    %c0_i32_0 = arith.constant 0 : i32
    return %arg0, %c0_i32 : i32, i32
  }
  func.func @transform_3(%arg0: i32, %arg1: i32, %arg2: memref<1xi32, #tpu.memory_space<smem>>) -> (i32, i32) {
    %c0_i32 = arith.constant 0 : i32
    %c0_i32_0 = arith.constant 0 : i32
    %c0_i32_1 = arith.constant 0 : i32
    return %c0_i32, %c0_i32_0 : i32, i32
  }
  func.func @transform_4(%arg0: i32, %arg1: i32, %arg2: memref<1xi32, #tpu.memory_space<smem>>) -> (i32, i32) {
    %c0_i32 = arith.constant 0 : i32
    %c0_i32_0 = arith.constant 0 : i32
    %c0_i32_1 = arith.constant 0 : i32
    return %c0_i32, %c0_i32_0 : i32, i32
  }
  func.func @transform_5(%arg0: i32, %arg1: i32, %arg2: memref<1xi32, #tpu.memory_space<smem>>) -> (i32, i32) {
    %c0_i32 = arith.constant 0 : i32
    %c0_i32_0 = arith.constant 0 : i32
    %c0_i32_1 = arith.constant 0 : i32
    return %c0_i32, %c0_i32_0 : i32, i32
  }
  func.func @transform_6(%arg0: i32, %arg1: i32, %arg2: memref<1xi32, #tpu.memory_space<smem>>) -> (i32, i32) {
    %c0_i32 = arith.constant 0 : i32
    %c0_i32_0 = arith.constant 0 : i32
    %c0_i32_1 = arith.constant 0 : i32
    return %c0_i32, %c0_i32_0 : i32, i32
  }
  func.func @transform_7(%arg0: i32, %arg1: i32, %arg2: memref<1xi32, #tpu.memory_space<smem>>) -> (i32, i32) {
    %c0_i32 = arith.constant 0 : i32
    %c0_i32_0 = arith.constant 0 : i32
    return %arg0, %c0_i32 : i32, i32
  }
}

</mosaic_0001>

<bundles_post_ra>
// kernel: encoder_forward.1
= control target key start
LH: loop header
LB: loop body
LE: loop exit
PB: predicated region body
PF: predicated region fallthrough
CT: control target
= control target key end

     0   :  { %s1209_s29 = smov 0   ;;  %s1211_s30 = smov 0   ;;  %s1522_s0 = inlined_call_operand.<no memory space> [shape: s32[1], index: 0, kind: input, shape index: {}]   ;;  %s1523_s1 = inlined_call_operand.vmem [shape: s32[8,1], index: 1, kind: input, shape index: {}]   ;;  %s1524_s2 = inlined_call_operand.vmem [shape: bf16[1,96,16], index: 2, kind: input, shape index: {}]   ;;  %s1525_s3 = inlined_call_operand.vmem [shape: f32[8,128], index: 3, kind: input, shape index: {}]   ;;  %s1526_s4 = inlined_call_operand.vmem [shape: bf16[16,384], index: 4, kind: input, shape index: {}]   ;;  %s1527_s5 = inlined_call_operand.vmem [shape: bf16[128,384], index: 5, kind: input, shape index: {}]   ;;  %s1528_s6 = inlined_call_operand.vmem [shape: f32[1,384], index: 6, kind: input, shape index: {}]   ;;  %s1529_s7 = inlined_call_operand.vmem [shape: f32[1,128], index: 7, kind: input, shape index: {}]   ;;  %s1530_s8 = inlined_call_operand.vmem [shape: f32[8,128], index: 8, kind: output, shape index: {}]  }
   0x1   :  { %13 = sst [smem:[#allocation5]] %s1522_s0  ;;  %s1213_s9 = smov 0  }
   0x2 LB: > { %s28_s0 = sadd.s32 1, %s1139_s30  ;;  %p945_p0 = scmp.ge.s32.totalorder %s1143_s9, 1  ;;  %s1143_s9 = sphi %s1213_s9, %s19_s9   ;;  %s1139_s30 = sphi %s1211_s30, %s1535_s30   ;;  %s1135_s29 = sphi %s1209_s29, %s1534_s29  }
   0x3   : > { %p29_p1 = scmp.ge.s32.totalorder %s28_s0, 3  ;;  %p276_p2 = scmp.lt.s32.totalorder %s1143_s9, 4 }
   0x5   : > { %s1537_s0 = smov (%p29_p1, %s28_s0), 0  ;;  %p277_p3 = pnand %p945_p0, %p276_p2 }
   0x6   : > { %s1230_s10 = sshll.u32 (!%p277_p3), %s1135_s29, 2  ;;  %p948_p5 = scmp.ne.s32.totalorder (!%p277_p3), %s1135_s29, 0 }
   0x7   : > { %280 = sbr.rel (%p277_p3) target bundleno = 572 (0x23c), region = 48  ;;  %p326_p4 = scmp.lt.s32.totalorder (!%p277_p3), %s1230_s10, 11 }
   0xe   : > { %s327_s11 = scalar_select %p326_p4, %s1230_s10, 11 }
   0xf   : > { %345 = sbr.rel (%p948_p5) target bundleno = 22 (0x16), region = 52  ;;  %v346_v0 = vld [vmem:[%s1525_s3] sm:$0xff] (!%p948_p5) }
  0x10   : > { %s947_s12 = sshll.u32 %s327_s11, 2  ;;  %347 = vst [vmem:[#allocation2] sm:$0xff] (!%p948_p5), %v346_v0 }
  0x11   : > { %s331_s15 = scalar_lea.vmem %s1524_s2, %s947_s12 }
  0x16 PF: > { %s349_s18 = sld [smem:[#allocation5]] }
  0x1c   : > { %s350_s19 = ssub.s32 %s349_s18, %s1230_s10 }
  0x1d   : > { %p351_p6 = scmp.gt.s32.totalorder %s350_s19, 0  ;;  %p950_p7 = scmp.lt.s32.totalorder %s350_s19, 4 }
  0x1f   : > { %s1539_s19 = smov (!%p351_p6, %s350_s19), 0 }
  0x20   : > { %s1541_s19 = smov (!%p950_p7, %s1539_s19), 4 }
  0x21   : > { %p955_p8 = scmp.le.s32.totalorder %s1541_s19, 0 }
  0x22   : > { %v1092_v1 = vld [vmem:[%s1526_s4 + $0x4] ss:$12 sps:$4 sm:$0xff] (!%p955_p8)   ;;  %v1094_v2 = vld [vmem:[%s1526_s4] ss:$12 sps:$4 sm:$0xff] (!%p955_p8)   ;;  %v1157_v3 = vmov (!%p955_p8), 0   ;;  %vm410_vm0 = vcmask (!%p955_p8), 130048   ;;  %v369_v42 = vlaneseq (!%p955_p8) }
  0x23   : > { %358 = sbr.rel (%p955_p8) target bundleno = 563 (0x233), region = 56  ;;  %449 = vmatprep.mubr.bf16.mxu0 (!%p955_p8), %v1157_v3  ;;  %417 = vmatprep.subr.bf16.mxu0 (!%p955_p8), %v1092_v1  ;;  %v1095_v4 = vld [vmem:[%s331_s15] sm:$0xff] (!%p955_p8)   ;;  %v1096_v5 = vld [vmem:[%s1526_s4 + $0x8] ss:$12 sps:$4 sm:$0xff] (!%p955_p8)   ;;  %v1274_v10 = vld [vmem:[%s1527_s5 + $0xc] sm:$0xff] (!%p955_p8) }
  0x24   : > { %418 = vmatpush1.bf16.msra.mxu0 (!%p955_p8), %v1094_v2  ;;  %1016 = vmatprep.mubr.msk.bf16.mxu1 (!%p955_p8), %vm410_vm0, %v1095_v4  ;;  %v1097_v6 = vld [vmem:[%s331_s15 + $0x8] sm:$0xff] (!%p955_p8)   ;;  %v1259_v7 = vld [vmem:[%s1523_s1] sm:$0xff] (!%p955_p8)  ;;  %v1279_v11 = vld [vmem:[%s1527_s5 + $0x14] sm:$0xf] (!%p955_p8)  ;;  %v370_v43 = vshrl.u32 (!%p955_p8), %v369_v42, 7 }
  0x25   : > { %1014 = vmatprep.subr.bf16.mxu1 (!%p955_p8), %v1096_v5  ;;  %v1264_v8 = vld [vmem:[%s1527_s5] sm:$0xff] (!%p955_p8)  ;;  %v1269_v9 = vld [vmem:[%s1527_s5 + $0x8] sm:$0xf] (!%p955_p8)  ;;  %v1284_v12 = vld [vmem:[%s1527_s5 + $0x18] sm:$0xff] (!%p955_p8) }
  0x26   : > { %1015 = vmatpush3.bf16.msra.mxu1 (!%p955_p8), %v1096_v5  ;;  %v1289_v13 = vld [vmem:[%s1527_s5 + $0x20] sm:$0xf] (!%p955_p8)  ;;  %v1294_v14 = vld [vmem:[%s1527_s5 + $0x24] sm:$0xff] (!%p955_p8)  ;;  %v1299_v15 = vld [vmem:[%s1527_s5 + $0x2c] sm:$0xf] (!%p955_p8)  ;;  %v371_v44 = vsub.s32 (!%p955_p8), 0, %v370_v43 }
  0x27   : > { %961 = vmatmul.mubr.msk.bf16.vlgmr.msra.gmra.mrb[0].mxu0 (!%p955_p8), %vm410_vm0, %v1095_v4  ;;  %v1304_v16 = vld [vmem:[%s1527_s5 + $0x30] sm:$0xff] (!%p955_p8)  ;;  %v1309_v17 = vld [vmem:[%s1527_s5 + $0x38] sm:$0xf] (!%p955_p8)  ;;  %v1314_v18 = vld [vmem:[%s1527_s5 + $0x3c] sm:$0xff] (!%p955_p8)  ;;  %v375_v46 = vsub.s32 (!%p955_p8), 1, %v370_v43  ;;  %v379_v47 = vsub.s32 (!%p955_p8), 2, %v370_v43 }
  0x28   : > { %459 = vmatprep.mubr.bf16.mxu0 (!%p955_p8), %v1157_v3  ;;  %v1319_v19 = vld [vmem:[%s1527_s5 + $0x44] sm:$0xf] (!%p955_p8)  ;;  %v1324_v20 = vld [vmem:[%s1527_s5 + $0x48] sm:$0xff] (!%p955_p8)  ;;  %v1329_v21 = vld [vmem:[%s1527_s5 + $0x50] sm:$0xf] (!%p955_p8) }
  0x29   : > { %1017 = vmatmul.mubr.msk.bf16.vlgmr.msra.gmra.mrb[0].mxu1 (!%p955_p8), %vm410_vm0, %v1097_v6  ;;  %v1334_v22 = vld [vmem:[%s1527_s5 + $0x54] sm:$0xff] (!%p955_p8)  ;;  %v1339_v23 = vld [vmem:[%s1527_s5 + $0x5c] sm:$0xf] (!%p955_p8)  ;;  %v1344_v24 = vld [vmem:[%s1527_s5 + $0x60] sm:$0xff] (!%p955_p8) }
  0x2a   : > { %v1349_v25 = vld [vmem:[%s1527_s5 + $0x68] sm:$0xf]  ;;  %v1354_v26 = vld [vmem:[%s1527_s5 + $0x6c] sm:$0xff]  ;;  %v1359_v27 = vld [vmem:[%s1527_s5 + $0x74] sm:$0xf]  ;;  %s1435_s28 = smov (!%p955_p8), 0  }
  0x2b   : > { %v1364_v28 = vld [vmem:[%s1527_s5 + $0x78] sm:$0xff]  ;;  %v1369_v29 = vld [vmem:[%s1527_s5 + $0x80] sm:$0xf]  ;;  %v1374_v30 = vld [vmem:[%s1527_s5 + $0x84] sm:$0xff] }
  0x2c   : > { %v1379_v31 = vld [vmem:[%s1527_s5 + $0x8c] sm:$0xf]  ;;  %v1384_v32 = vld [vmem:[%s1527_s5 + $0x90] sm:$0xff]  ;;  %v1389_v33 = vld [vmem:[%s1527_s5 + $0x98] sm:$0xf] }
  0x2d   : > { %v1394_v34 = vld [vmem:[%s1527_s5 + $0x9c] sm:$0xff]  ;;  %v1399_v35 = vld [vmem:[%s1527_s5 + $0xa4] sm:$0xf]  ;;  %v1404_v36 = vld [vmem:[%s1527_s5 + $0xa8] sm:$0xff] }
  0x2e   : > { %v1409_v37 = vld [vmem:[%s1527_s5 + $0xb0] sm:$0xf]  ;;  %v1414_v38 = vld [vmem:[%s1527_s5 + $0xb4] sm:$0xff]  ;;  %v1419_v39 = vld [vmem:[%s1527_s5 + $0xbc] sm:$0xf] }
  0x2f   : > { %962 = vmatmul.mubr.msk.bf16.gmra.mrb[4].mxu0 %vm410_vm0, %v1097_v6  ;;  %v1424_v40 = vld [vmem:[%s1529_s7] ss:$0 sm:$0xff] }
  0x30   : > { %v565_v41 = vld [vmem:[#allocation2] sm:$0xff]  }
  0x31   : > { %v367_v45 = vld [vmem:[%s1528_s6] sm:$0x7] }
  0x32   : > { %v372_v48 = vrot.slane %v367_v45, %v371_v44  ;;  %v376_v49 = vrot.slane %v367_v45, %v375_v46  ;;  %v380_v51 = vrot.slane %v367_v45, %v379_v47  ;;  %v1531_v46 = vmov %v565_v41 }
  0xfa   : > { %v451_v50 = vpop.f32.mrb[0].mxu0 }
  0xfb   : > { %v452_v52 = vadd.f32 %v451_v50, %v372_v48  ;;  %v453_v53 = vpop.f32.mrb[1].mxu0 }
  0xfc   : > { %v454_v54 = vadd.f32 %v453_v53, %v376_v49  ;;  %v455_v55 = vpop.f32.mrb[2].mxu0  ;;  %v1018_v58 = vpop.f32.mrb[0].mxu1 }
  0xfd   : > { %519 = vst [vmem:[#allocation3] sm:$0xff] %v452_v52  ;;  %v456_v56 = vadd.f32 %v455_v55, %v372_v48  ;;  %v457_v57 = vpop.f32.mrb[3].mxu0  ;;  %v513_v60 = vadd.f32 %v1018_v58, %v380_v51  ;;  %v504_v61 = vpop.f32.mrb[1].mxu1 }
  0xfe   : > { %520 = vst [vmem:[#allocation3 + $0x8] sm:$0xff] %v454_v54  ;;  %v458_v59 = vadd.f32 %v457_v57, %v376_v49  ;;  %v505_v62 = vadd.f32 %v504_v61, %v380_v51  ;;  %v1019_v63 = vpop.f32.mrb[2].mxu1 }
  0xff   : > { %522 = vst [vmem:[#allocation3 + $0x18] sm:$0xff] %v456_v56  ;;  %527 = vst [vmem:[#allocation3 + $0x40] sm:$0xff] %v513_v60  ;;  %v516_v0 = vadd.f32 %v1019_v63, %v380_v51  ;;  %v507_v1 = vpop.f32.mrb[3].mxu1 }
 0x100   : > { %523 = vst [vmem:[#allocation3 + $0x20] sm:$0xff] %v458_v59  ;;  %521 = vst [vmem:[#allocation3 + $0x10] sm:$0xff] %v505_v62  ;;  %v508_v2 = vadd.f32 %v507_v1, %v380_v51 }
 0x101   : > { %530 = vst [vmem:[#allocation3 + $0x58] sm:$0xff] %v516_v0 }
 0x102   : > { %v461_v3 = vpop.f32.mrb[4].mxu0  ;;  %524 = vst [vmem:[#allocation3 + $0x28] sm:$0xff] %v508_v2  ;;  %891 = sbr.rel (%p955_p8) target bundleno = 562 (0x232), region = 98 }
 0x103   : > { %v462_v4 = vadd.f32 %v461_v3, %v372_v48  ;;  %v463_v5 = vpop.f32.mrb[5].mxu0 }
 0x104   : > { %v464_v6 = vadd.f32 %v463_v5, %v376_v49  ;;  %v465_v42 = vpop.f32.mrb[6].mxu0 }
 0x105   : > { %525 = vst [vmem:[#allocation3 + $0x30] sm:$0xff] %v462_v4  ;;  %v466_v43 = vadd.f32 %v465_v42, %v372_v48  ;;  %v467_v44 = vpop.f32.mrb[7].mxu0 }
 0x106   : > { %526 = vst [vmem:[#allocation3 + $0x38] sm:$0xff] %v464_v6  ;;  %v468_v45 = vadd.f32 %v467_v44, %v376_v49 }
 0x107   : > { %528 = vst [vmem:[#allocation3 + $0x48] sm:$0xff] %v466_v43 }
 0x108   : > { %529 = vst [vmem:[#allocation3 + $0x50] sm:$0xff] %v468_v45 }
 0x109 LB: >> { %v969_v47 = vcombine.high %v1264_v8, %v1274_v10  ;;  %v968_v48 = vcombine.low %v1264_v8, %v1274_v10  ;;  %v972_v49 = vcombine.high %v1284_v12, %v1294_v14  ;;  %v971_v50 = vcombine.low %v1284_v12, %v1294_v14  ;;  %s819_s11 = sadd.s32 %s1151_s28, %s1230_s10  ;;  %s966_s12 = sshll.u32 %s1151_s28, 3  ;;  %s1151_s28 = sphi %s1435_s28, %s569_s28   ;;  %v1147_v41 = vphi %v565_v41, %v1532_v41  }
 0x10a   : >> { %v970_v51 = vcombine.low %v1269_v9, %v1279_v11  ;;  %v975_v52 = vcombine.high %v1304_v16, %v1314_v18  ;;  %v1158_v53 = vmov 0.0   ;;  %v973_v54 = vcombine.low %v1289_v13, %v1299_v15  ;;  %s574_s13 = sshra.s32 %s966_s12, 3  ;;  %s569_s28 = sadd.s32 1, %s1151_s28  }
 0x10b   : >> { %711 = vmatprep.subr.bf16.mxu0 %v969_v47  ;;  %1020 = vmatprep.subr.bf16.mxu1 %v1158_v53  ;;  %v1159_v55 = vmov 0   ;;  %v974_v56 = vcombine.low %v1304_v16, %v1314_v18  ;;  %v820_v57 = vstv %s819_s11  ;;  %v978_v58 = vcombine.high %v1324_v20, %v1334_v22  ;;  %s1001_s14 = smul.u32 24, %s574_s13  ;;  %p568_p9 = scmp.ge.s32.totalorder %s569_s28, %s1541_s19 }
 0x10c   : >> { %712 = vmatpush1.bf16.msra.mxu0 %v968_v48  ;;  %1021 = vmatpush3.bf16.msra.mxu1 %v970_v51  ;;  %vm1160_vm1 = vmmov 0   ;;  %vm821_vm2 = vcmp.lt.s32.totalorder %v820_v57, %v1259_v7  ;;  %v976_v59 = vcombine.low %v1309_v17, %v1319_v19  ;;  %v977_v61 = vcombine.low %v1324_v20, %v1334_v22 }
 0x10d   : >> { %713 = vmatprep.subr.bf16.mxu0 %v972_v49  ;;  %743 = vmatprep.mubr.bf16.mxu0 %v1159_v55  ;;  %v822_v60 = vsel %vm821_vm2, 1, %v1159_v55  ;;  %v981_v62 = vcombine.high %v1344_v24, %v1354_v26  ;;  %v979_v63 = vcombine.low %v1329_v21, %v1339_v23  ;;  %v980_v0 = vcombine.low %v1344_v24, %v1354_v26  ;;  %s578_s15 = scalar_lea.vmem [#allocation3], %s1001_s14 }
 0x10e   : >> { %1022 = vmatprep.subr.bf16.mxu1 %v1158_v53  ;;  %1098 = vset.pattern.permute.xlu0 %v1159_v55  ;;  %v984_v1 = vcombine.high %v1364_v28, %v1374_v30  ;;  %v982_v2 = vcombine.low %v1349_v25, %v1359_v27  ;;  %v983_v3 = vcombine.low %v1364_v28, %v1374_v30 }
 0x10f   : >> { %1036 = vmatprep.mubr.msk.bf16.mxu1 %vm1160_vm1, %v1158_v53  ;;  %824 = vperm.xlu0 %1098, %v822_v60   ;;  %v987_v4 = vcombine.high %v1384_v32, %v1394_v34  ;;  %v985_v5 = vcombine.low %v1369_v29, %v1379_v31  ;;  %v986_v6 = vcombine.low %v1384_v32, %v1394_v34  ;;  %v579_v47 = vld [vmem:[%s578_s15] sm:$0xff]  ;;  %v580_v48 = vld [vmem:[%s578_s15 + $0x8] sm:$0xff] }
 0x110   : >> { %714 = vmatpush1.bf16.msra.mxu0 %v971_v50  ;;  %1023 = vmatpush3.bf16.msra.mxu1 %v973_v54  ;;  %v990_v42 = vcombine.high %v1404_v36, %v1414_v38  ;;  %v988_v43 = vcombine.low %v1389_v33, %v1399_v35  ;;  %v989_v44 = vcombine.low %v1404_v36, %v1414_v38 }
 0x111   : >> { %715 = vmatprep.subr.bf16.mxu0 %v975_v52  ;;  %1024 = vmatprep.subr.bf16.mxu1 %v1158_v53  ;;  %v991_v45 = vcombine.low %v1409_v37, %v1419_v39  ;;  %v582_v46 = vpack.c.bf16 %v1147_v41, %v1147_v41 }
 0x114   : >> { %716 = vmatpush1.bf16.msra.mxu0 %v974_v56  ;;  %1025 = vmatpush3.bf16.msra.mxu1 %v976_v59 }
 0x115   : >> { %717 = vmatprep.subr.bf16.mxu0 %v978_v58  ;;  %1026 = vmatprep.subr.bf16.mxu1 %v1158_v53 }
 0x118   : >> { %718 = vmatpush1.bf16.msra.mxu0 %v977_v61  ;;  %1027 = vmatpush3.bf16.msra.mxu1 %v979_v63 }
 0x119   : >> { %719 = vmatprep.subr.bf16.mxu0 %v981_v62  ;;  %1028 = vmatprep.subr.bf16.mxu1 %v1158_v53 }
 0x11c   : >> { %720 = vmatpush1.bf16.msra.mxu0 %v980_v0  ;;  %1029 = vmatpush3.bf16.msra.mxu1 %v982_v2  ;;  %v581_v2 = vld [vmem:[%s578_s15 + $0x10] sm:$0xff] }
 0x11d   : >> { %721 = vmatprep.subr.bf16.mxu0 %v984_v1  ;;  %1030 = vmatprep.subr.bf16.mxu1 %v1158_v53 }
 0x120   : >> { %722 = vmatpush1.bf16.msra.mxu0 %v983_v3  ;;  %1031 = vmatpush3.bf16.msra.mxu1 %v985_v5 }
 0x121   : >> { %723 = vmatprep.subr.bf16.mxu0 %v987_v4  ;;  %1032 = vmatprep.subr.bf16.mxu1 %v1158_v53 }
 0x124   : >> { %724 = vmatpush1.bf16.msra.mxu0 %v986_v6  ;;  %1033 = vmatpush3.bf16.msra.mxu1 %v988_v43 }
 0x125   : >> { %725 = vmatprep.subr.bf16.mxu0 %v990_v42  ;;  %1034 = vmatprep.subr.bf16.mxu1 %v1158_v53 }
 0x128   : >> { %726 = vmatpush1.bf16.msra.mxu0 %v989_v44  ;;  %1035 = vmatpush3.bf16.msra.mxu1 %v991_v45 }
 0x12b   : >> { %744 = vmatmul.mubr.bf16.vlgmr.msra.gmra.mrb[0].mxu0 %v582_v46  ;;  %1037 = vmatmul.mubr.bf16.vlgmr.msra.gmra.mrb[0].mxu1 %v582_v46 }
 0x18e   : >> { %v825_v42 = vpop.permute.xlu0 %824 }
 0x18f   : >> { %vm826_vm3 = vcmp.eq.s32.totalorder %v825_v42, 1 }
 0x1fe   : >> { %v745_v49 = vpop.f32.mrb[0].mxu0  ;;  %v786_v55 = vpop.f32.mrb[0].mxu1 }
 0x1ff   : >> { %v792_v50 = vadd.f32 %v745_v49, %v579_v47  ;;  %v747_v51 = vpop.f32.mrb[1].mxu0  ;;  %v1038_v58 = vpop.f32.mrb[1].mxu1  ;;  %v812_v63 = vadd.f32 %v1424_v40, %v786_v55 }
 0x200   : >> { %v793_v52 = vadd.f32 %v747_v51, %v580_v48  ;;  %v749_v54 = vpop.f32.mrb[2].mxu0  ;;  %v789_v53 = vpop.f32.mrb[2].mxu1 }
 0x201   : >> { %v992_v56 = vmul.f32 -1.442695, %v792_v50  ;;  %v750_v57 = vpop.f32.mrb[3].mxu0  ;;  %v1039_v59 = vpop.f32.mrb[3].mxu1 }
 0x202   : >> { %v993_v60 = vmul.f32 -1.442695, %v793_v52 }
 0x203   : >> { %1099 = vpow2.f32 %v992_v56 }
 0x204   : >> { %1101 = vpow2.f32 %v993_v60 }
 0x20d   : >> { %v1100_v61 = vpop.eup %1099 }
 0x20e   : >> { %v800_v62 = vadd.f32 1.0, %v1100_v61  ;;  %v1102_v0 = vpop.eup %1101 }
 0x20f   : >> { %v801_v4 = vadd.f32 1.0, %v1102_v0 }
 0x210   : >> { %1103 = vrcp.f32 %v800_v62 }
 0x21a   : >> { %v1104_v1 = vpop.eup %1103 }
 0x21b   : >> { %v813_v3 = vmul.f32 %v1104_v1, %v812_v63 }
 0x21d   : >> { %v814_v5 = vadd.f32 %v813_v3, %v581_v2 }
 0x21f   : >> { %1105 = vtanh.f32 %v814_v5 }
 0x220   : >> { %1107 = vrcp.f32 %v801_v4 }
 0x229   : >> { %v1106_v6 = vpop.eup %1105 }
 0x22a   : >> { %v816_v43 = vsub.f32 %v1147_v41, %v1106_v6  ;;  %v1108_v44 = vpop.eup %1107 }
 0x22b   : > { %571 = sbr.rel (!%p568_p9) target bundleno = 265 (0x109), region = 104 }
 0x22c   : >> { %v817_v45 = vmul.f32 %v1108_v44, %v816_v43 }
 0x22e   : >> { %v818_v46 = vadd.f32 %v1106_v6, %v817_v45 }
 0x230   : >> { %v827_v47 = vsel %vm826_vm3, %v818_v46, %v1147_v41  }
 0x231   : >> { %v1532_v41 = vmov %v827_v47  ;;  %v1533_v46 = vmov (%p568_p9), %v827_v47 }
 0x232 PF: > { %828 = vst [vmem:[#allocation2] sm:$0xff] %v1155_v46  ;;  %v1155_v46 = vphi %v1531_v46, %v1533_v46  }
 0x233 PF: > { %p995_p10 = scmp.ne.s32.totalorder %s1135_s29, 2 }
 0x235   : > { %832 = sbr.rel (%p995_p10) target bundleno = 572 (0x23c), region = 67 }
 0x239   : > { %v833_v41 = vld [vmem:[#allocation2] sm:$0xff] (!%p995_p10) }
 0x23a   : > { %834 = vst [vmem:[%s1530_s8] sm:$0xff] (!%p995_p10), %v833_v41 }
 0x23c PF: > { %s19_s9 = sadd.s32 1, %s1143_s9   ;;  %s1534_s29 = smov %s1139_s30 }
 0x23d   : > { %p16_p11 = scmp.ge.s32.totalorder %s19_s9, 5   ;;  %s1535_s30 = smov %s1537_s0 }
 0x23f   :  { %18 = sbr.rel (!%p16_p11) target bundleno = 2 (0x2), region = 115 }

</bundles_post_ra>
